<compile_context>
chip_gen: v5e
topology: v5e:2x2
jax: 0.10.0
libtpu: 0.0.40
codegen_flags: <defaults>
</compile_context>

<pallas_src>
import jax
import jax.numpy as jnp
from jax.experimental import pallas as pl
from jax.experimental.pallas import tpu as pltpu

_LANES = 128            # lane width (last dim of every block)
_SUB = 8                # sublane multiple
_MAX_BLOCK_ROWS = 1024  # 1024 x 128 f32 = 512 KiB per input block
_PAD_POS = 1e4          # softplus(-(1e4 - 0)) == 0 exactly in f32


def _softplus_neg(diff):
    # -log(sigmoid(diff)) == softplus(-diff), numerically stable.
    return jnp.maximum(-diff, 0.0) + jnp.log1p(jnp.exp(-jnp.abs(diff)))


def _partial_sum_kernel(pos_ref, neg_ref, part_ref):
    # One grid step: stream one (block_rows, 128) tile of each input, compute
    # the pairwise loss and fold it to an (8,128) partial sum with pure VPU
    # adds (no per-step cross-lane XLU reduce; that happens once in the
    # wrapper over the tiny partials array).
    diff = pos_ref[...].astype(jnp.float32) - neg_ref[...].astype(jnp.float32)
    loss = _softplus_neg(diff)
    partial = jnp.sum(loss.reshape(-1, _SUB, _LANES), axis=0)   # (8, 128)
    part_ref[...] = partial.reshape(1, _SUB, _LANES)


def _elementwise_kernel(pos_ref, neg_ref, out_ref):
    diff = pos_ref[...].astype(jnp.float32) - neg_ref[...].astype(jnp.float32)
    out_ref[...] = _softplus_neg(diff)


def _pad_and_fold(x, n, n_pad, pad_value):
    x = x.reshape(-1)
    if n_pad != n:
        # TODO(synk): this jnp.pad is one extra HBM pass over the input when N
        # is not tile-aligned; avoiding it entirely needs ragged in-kernel
        # tail handling.  When N is tile-aligned the reshape below is free.
        x = jnp.pad(x, (0, n_pad - n), constant_values=pad_value)
    return x.reshape(n_pad // _LANES, _LANES)


def pair_wise_loss(positives, negatives, *, reduce=True, reduction="mean",
                   block_rows=None):
    """Pallas implementation of PairWiseLoss.forward (BPR log-sigmoid score)."""
    assert reduction in ("none", "mean", "sum")
    do_reduce = reduce and reduction != "none"

    n = positives.shape[0]

    # Row/tile geometry: rows of 128 lanes, block rows a multiple of 8.
    rows_needed = -(-n // _LANES) if n > 0 else 1
    rows8 = max(_SUB, -(-rows_needed // _SUB) * _SUB)
    if block_rows is None:
        block_rows = min(_MAX_BLOCK_ROWS, rows8)
    else:
        block_rows = max(_SUB, (block_rows // _SUB) * _SUB)
    num_blocks = -(-rows8 // block_rows)
    rows = num_blocks * block_rows
    n_pad = rows * _LANES

    # Pad so the padded-lane loss is exactly 0 (no in-kernel mask needed):
    # diff = 1e4 - 0  ->  exp(-1e4) == 0 in f32  ->  softplus == 0.
    pos2d = _pad_and_fold(positives, n, n_pad, _PAD_POS)
    neg2d = _pad_and_fold(negatives, n, n_pad, 0.0)

    in_spec = pl.BlockSpec((block_rows, _LANES), lambda i: (i, 0))

    if do_reduce:
        partials = pl.pallas_call(
            _partial_sum_kernel,
            out_shape=jax.ShapeDtypeStruct((num_blocks, _SUB, _LANES),
                                           jnp.float32),
            grid_spec=pltpu.PrefetchScalarGridSpec(
                num_scalar_prefetch=0,
                grid=(num_blocks,),
                in_specs=[in_spec, in_spec],
                out_specs=pl.BlockSpec((1, _SUB, _LANES),
                                       lambda i: (i, 0, 0)),
            ),
            compiler_params=pltpu.CompilerParams(
                dimension_semantics=("parallel",)),
        )(pos2d, neg2d)
        total = jnp.sum(partials)  # tiny follow-up reduce over per-block partials
        if reduction == "mean":
            # Guard: torch would give NaN for N == 0; we return 0.0 instead.
            return total / jnp.float32(max(n, 1))
        return total
    else:
        out2d = pl.pallas_call(
            _elementwise_kernel,
            out_shape=jax.ShapeDtypeStruct((rows, _LANES), jnp.float32),
            grid_spec=pltpu.PrefetchScalarGridSpec(
                num_scalar_prefetch=0,
                grid=(num_blocks,),
                in_specs=[in_spec, in_spec],
                out_specs=pl.BlockSpec((block_rows, _LANES),
                                       lambda i: (i, 0)),
            ),
            compiler_params=pltpu.CompilerParams(
                dimension_semantics=("parallel",)),
        )(pos2d, neg2d)
        return out2d.reshape(-1)[:n]


if __name__ == "__main__":
    key = jax.random.PRNGKey(0)
    k_pos, k_neg = jax.random.split(key)

    # Small shapes: 1000 (pos, neg) score pairs; exercises tail padding.
    N = 1000
    positives = jax.random.normal(k_pos, (N,), dtype=jnp.float32)
    negatives = jax.random.normal(k_neg, (N,), dtype=jnp.float32)

    # Default PairWiseLoss(): reduce=True, reduction='mean'; plus other modes.
    out_mean = pair_wise_loss(positives, negatives, reduce=True, reduction="mean")
    out_sum = pair_wise_loss(positives, negatives, reduce=True, reduction="sum")
    out_none = pair_wise_loss(positives, negatives, reduce=True, reduction="none")
    jax.block_until_ready((out_mean, out_sum, out_none))

    # Pure-JAX reference (softplus(-(p - n)) + torch-style dim-0 reduction).
    ref_vals = jnp.logaddexp(0.0, -(positives - negatives))
    assert out_none.shape == (N,)
    assert jnp.allclose(out_none, ref_vals, rtol=1e-5, atol=1e-5)
    assert jnp.allclose(out_sum, jnp.sum(ref_vals, axis=0), rtol=1e-5, atol=1e-4)
    assert jnp.allclose(out_mean, jnp.sum(ref_vals, axis=0) / N, rtol=1e-5, atol=1e-5)

    # Multi-block grid path (small block_rows keeps the test tiny).
    N2 = 3000
    p2 = jax.random.normal(k_pos, (N2,), dtype=jnp.float32)
    n2 = jax.random.normal(k_neg, (N2,), dtype=jnp.float32)
    out2 = pair_wise_loss(p2, n2, reduce=True, reduction="mean", block_rows=8)
    jax.block_until_ready(out2)
    ref2 = jnp.mean(jnp.logaddexp(0.0, -(p2 - n2)))
    assert jnp.allclose(out2, ref2, rtol=1e-5, atol=1e-5)

    print("KERNEL_OK")
</pallas_src>

<mosaic_0001>
module attributes {stable_mosaic.version = 11 : i64} {
  func.func @_partial_sum_kernel(%arg0: i32, %arg1: memref<8x128xf32, #tpu.memory_space<vmem>>, %arg2: memref<8x128xf32, #tpu.memory_space<vmem>>, %arg3: memref<1x8x128xf32, #tpu.memory_space<vmem>>) attributes {dimension_semantics = [#tpu.dimension_semantics<parallel>], iteration_bounds = array<i64: 1>, scalar_prefetch = 0 : i64, scratch_operands = 0 : i64, tpu.core_type = #tpu.core_type<tc>, window_params = [{transform_indices = @transform_0, window_bounds = array<i64: 8, 128>}, {transform_indices = @transform_1, window_bounds = array<i64: 8, 128>}, {transform_indices = @transform_2, window_bounds = array<i64: 1, 8, 128>}]} {
    %c0 = arith.constant 0 : index
    %c0_0 = arith.constant 0 : index
    %0 = vector.load %arg1[%c0, %c0_0] : memref<8x128xf32, #tpu.memory_space<vmem>>, vector<8x128xf32>
    %c0_1 = arith.constant 0 : index
    %c0_2 = arith.constant 0 : index
    %1 = vector.load %arg2[%c0_1, %c0_2] : memref<8x128xf32, #tpu.memory_space<vmem>>, vector<8x128xf32>
    %2 = arith.subf %0, %1 : vector<8x128xf32>
    %cst = arith.constant 0.000000e+00 : f32
    %3 = vector.broadcast %cst : f32 to vector<8x128xf32>
    %4 = arith.subf %3, %2 : vector<8x128xf32>
    %cst_3 = arith.constant 0.000000e+00 : f32
    %5 = vector.broadcast %cst_3 : f32 to vector<8x128xf32>
    %6 = arith.maximumf %4, %5 : vector<8x128xf32>
    %7 = math.absf %2 : vector<8x128xf32>
    %cst_4 = arith.constant 0.000000e+00 : f32
    %8 = vector.broadcast %cst_4 : f32 to vector<8x128xf32>
    %9 = arith.subf %8, %7 : vector<8x128xf32>
    %10 = math.exp %9 : vector<8x128xf32>
    %11 = math.log1p %10 : vector<8x128xf32>
    %12 = arith.addf %6, %11 : vector<8x128xf32>
    %13 = vector.shape_cast %12 : vector<8x128xf32> to vector<1x8x128xf32>
    %cst_5 = arith.constant dense<0.000000e+00> : vector<8x128xf32>
    %14 = vector.multi_reduction <add>, %13, %cst_5 [0] : vector<1x8x128xf32> to vector<8x128xf32>
    %15 = vector.shape_cast %14 : vector<8x128xf32> to vector<1x8x128xf32>
    %c0_6 = arith.constant 0 : index
    %c0_7 = arith.constant 0 : index
    %c0_8 = arith.constant 0 : index
    %16 = vector.load %arg3[%c0_6, %c0_7, %c0_8] : memref<1x8x128xf32, #tpu.memory_space<vmem>>, vector<1x8x128xf32>
    tpu.vector_store %arg3[%c0_6, %c0_7, %c0_8], %15 {strides = array<i32>} : memref<1x8x128xf32, #tpu.memory_space<vmem>>, vector<1x8x128xf32>,
    return
  }
  func.func @transform_0(%arg0: i32) -> (i32, i32) {
    %c0_i32 = arith.constant 0 : i32
    %c0_i32_0 = arith.constant 0 : i32
    return %arg0, %c0_i32 : i32, i32
  }
  func.func @transform_1(%arg0: i32) -> (i32, i32) {
    %c0_i32 = arith.constant 0 : i32
    %c0_i32_0 = arith.constant 0 : i32
    return %arg0, %c0_i32 : i32, i32
  }
  func.func @transform_2(%arg0: i32) -> (i32, i32, i32) {
    %c0_i32 = arith.constant 0 : i32
    %c0_i32_0 = arith.constant 0 : i32
    %c0_i32_1 = arith.constant 0 : i32
    return %arg0, %c0_i32, %c0_i32_0 : i32, i32, i32
  }
}

</mosaic_0001>

<bundles_post_ra>
// kernel: tpu_custom_call.1
= control target key start
LH: loop header
LB: loop body
LE: loop exit
PB: predicated region body
PF: predicated region fallthrough
CT: control target
= control target key end

     0   :  { %7 = vsyncpa [#allocation3], 0  ;;  %s191_s0 = inlined_call_operand.hbm [shape: f32[8,128], index: 0, kind: input, shape index: {}]   ;;  %s192_s1 = inlined_call_operand.hbm [shape: f32[8,128], index: 1, kind: input, shape index: {}]   ;;  %s193_s2 = inlined_call_operand.hbm [shape: f32[1,8,128], index: 2, kind: output, shape index: {}]  }
   0x1   :  { %8 = vsyncpa [#allocation6], 0 }
   0x2   :  { %9 = vsyncpa [#allocation4], 0  ;;  %s15_s11 = sshll.u32 %s191_s0, 4  ;;  %s164_s12 = smov [#allocation2]   ;;  %s16_s11 = int_to_ptr.hbm [resolvable:$true] %s15_s11 }
   0x3   :  { %s17_s13 = sshll.u32 %s164_s12, 4  ;;  %s26_s16 = sshll.u32 %s192_s1, 4  ;;  %s18_s13 = int_to_ptr.vmem [resolvable:$true] %s17_s13  ;;  %s27_s16 = int_to_ptr.hbm [resolvable:$true] %s26_s16 }
   0x4   :  { %20 = dma.hbm_to_vmem [thread:$0]  %s16_s11, 128, %s18_s13, [#allocation3]  }
   0x5   :  { %s165_s17 = smov [#allocation5]  }
   0x6   :  { %s28_s18 = sshll.u32 %s165_s17, 4  ;;  %s29_s18 = int_to_ptr.vmem [resolvable:$true] %s28_s18 }
   0x7   :  { %31 = dma.hbm_to_vmem [thread:$0]  %s27_s16, 128, %s29_s18, [#allocation6]  }
   0x8   :  { %158 = dma.done.wait [#allocation3], 128  }
   0x9   :  { %159 = vsyncadd [#allocation3], 4294967168 }
   0xa   :  { %160 = dma.done.wait [#allocation6], 128  }
   0xb   :  { %161 = vsyncadd [#allocation6], 4294967168  ;;  %v40_v0 = vld [vmem:[#allocation2] sm:$0xff]  ;;  %v41_v1 = vld [vmem:[#allocation5] sm:$0xff]  ;;  %s166_s0 = smov [#allocation7]   ;;  %s68_s21 = sshll.u32 %s193_s2, 4  ;;  %s69_s21 = int_to_ptr.hbm [resolvable:$true] %s68_s21 }
   0xc   :  { %v42_v2 = vsub.f32 %v40_v0, %v41_v1  ;;  %s66_s1 = sshll.u32 %s166_s0, 4  ;;  %s67_s1 = int_to_ptr.vmem [resolvable:$true] %s66_s1 }
   0xe   :  { %v45_v3 = vand.u32 2147483647, %v42_v2  ;;  %v43_v10 = vsub.f32 0.0, %v42_v2 }
  0x10   :  { %v46_v4 = vsub.f32 0.0, %v45_v3  ;;  %v44_v14 = vmax.f32 %v43_v10, 0.0 }
  0x12   :  { %v47_v5 = vmul.f32 1.442695, %v46_v4 }
  0x14   :  { %82 = vpow2.f32 %v47_v5 }
  0x1a   :  { %v83_v6 = vpop.eup %82 }
  0x1b   :  { %v49_v7 = vadd.f32 1.0, %v83_v6  ;;  %v52_v8 = vmul.f32 -0.5, %v83_v6  ;;  %v55_v11 = vand.u32 2147483647, %v83_v6 }
  0x1d   :  { %84 = vlog2.f32 %v49_v7  ;;  %v53_v9 = vadd.f32 1.0, %v52_v8  ;;  %vm56_vm0 = vcmp.lt.f32.partialorder %v55_v11, 0.0004427343 }
  0x1f   :  { %v54_v12 = vmul.f32 %v83_v6, %v53_v9 }
  0x23   :  { %v85_v13 = vpop.eup %84 }
  0x24   :  { %v51_v15 = vmul.f32 0.6931472, %v85_v13 }
  0x26   :  { %v57_v16 = vsel %vm56_vm0, %v54_v12, %v51_v15 }
  0x27   :  { %v58_v17 = vadd.f32 %v57_v16, %v44_v14 }
  0x29   :  { %60 = vst [vmem:[#allocation7] sm:$0xff] %v58_v17 }
  0x2a   :  { %71 = dma.vmem_to_hbm [thread:$0]  %s67_s1, 128, %s69_s21, [#allocation4]  }
  0x2b   :  { %162 = dma.done.wait [#allocation4], 128  }
  0x2c   :  { %163 = vsyncadd [#allocation4], 4294967168 }
  0x2d   :  { %76 = vsyncpa [#allocation3], 1 }
  0x2e   :  { %77 = vsyncpa [#allocation6], 1 }
  0x2f   :  { %78 = vsyncpa [#allocation4], 1 }

</bundles_post_ra>
